<compile_context>
chip_gen: v6e
topology: v6e:2x2x1
jax: 0.10.0
libtpu: 0.0.40
codegen_flags: <defaults>
</compile_context>

<pallas_src>
import jax
import jax.numpy as jnp
from jax import lax
from jax.experimental import pallas as pl
from jax.experimental.pallas import tpu as pltpu


def gsl_mask_kernel(keep_r_ref, keep_c_ref, adj_ref, out_ref):
    # keep_r_ref: (bt, R, 1)  -- 1.0 if the row-node is preserved
    # keep_c_ref: (bt, 1, N)  -- 1.0 if the col-node is preserved
    # adj_ref/out_ref: (bt, R, N)
    mask = jnp.maximum(keep_r_ref[...], keep_c_ref[...])   # row OR col keep
    out_ref[...] = adj_ref[...] * mask


def _pick_row_tile(n, dtype_bytes, target_tile_bytes):
    """Largest multiple-of-8 row count <= budget that divides N (else full N)."""
    max_rows = max(8, target_tile_bytes // max(1, n * dtype_bytes))
    if n <= max_rows:
        return n
    tm = (min(max_rows, n) // 8) * 8
    while tm >= 8:
        if n % tm == 0:
            return tm
        tm -= 8
    return n  # fall back to full plane (N not 8-divisible)


def _pick_batch_tile(b, n, dtype_bytes, target_tile_bytes):
    """How many (N, N) planes per grid step for small graphs; divides B."""
    per_plane = max(1, n * n * dtype_bytes)
    bt = max(1, target_tile_bytes // per_plane)
    bt = min(bt, b)
    while b % bt != 0:
        bt -= 1
    return bt


def gsl_forward(adj, score, rate, *, target_tile_bytes=2 * 1024 * 1024):
    """JAX/Pallas equivalent of GSL.forward(adj, score)."""
    B, N, _ = adj.shape
    K = int(rate * N)
    dtype_bytes = jnp.dtype(adj.dtype).itemsize

    if K <= 0:
        # Empty mask: nothing preserved -> all-zero adjacency.
        return jnp.zeros_like(adj)

    # --- cheap O(B*N) prep in XLA: one-hot keep vectors -----------------------
    s = jnp.squeeze(score, axis=-1) if score.ndim == 3 else score      # (B, N)
    _, idx = lax.top_k(s, K)                                           # (B, K)
    keep = jnp.zeros((B, N), adj.dtype)
    keep = keep.at[jnp.arange(B)[:, None], idx].set(jnp.asarray(1, adj.dtype))
    keep_r = keep.reshape(B, N, 1)
    keep_c = keep.reshape(B, 1, N)

    cost = pl.CostEstimate(
        flops=2 * B * N * N,
        transcendentals=0,
        bytes_accessed=2 * B * N * N * dtype_bytes,
    )
    cparams = pltpu.CompilerParams(
        dimension_semantics=("parallel", "parallel"),
        vmem_limit_bytes=48 * 1024 * 1024,   # explicit; safe on v5e/v6e/v7x
    )

    if N < 128:
        # Small-graph path: pack several batches per grid step.
        bt = _pick_batch_tile(B, N, dtype_bytes, target_tile_bytes)
        grid = (B // bt, 1)
        in_specs = [
            pl.BlockSpec((bt, N, 1), lambda b, r: (b, 0, 0)),
            pl.BlockSpec((bt, 1, N), lambda b, r: (b, 0, 0)),
            pl.BlockSpec((bt, N, N), lambda b, r: (b, 0, 0)),
        ]
        out_specs = pl.BlockSpec((bt, N, N), lambda b, r: (b, 0, 0))
    else:
        # Row-tiled path: N-independent VMEM footprint, pipelined over rows.
        tm = _pick_row_tile(N, dtype_bytes, target_tile_bytes)
        grid = (B, N // tm)
        in_specs = [
            pl.BlockSpec((1, tm, 1), lambda b, r: (b, r, 0)),
            pl.BlockSpec((1, 1, N), lambda b, r: (b, 0, 0)),
            pl.BlockSpec((1, tm, N), lambda b, r: (b, r, 0)),
        ]
        out_specs = pl.BlockSpec((1, tm, N), lambda b, r: (b, r, 0))

    return pl.pallas_call(
        gsl_mask_kernel,
        out_shape=jax.ShapeDtypeStruct((B, N, N), adj.dtype),
        grid_spec=pltpu.PrefetchScalarGridSpec(
            num_scalar_prefetch=0,
            grid=grid,
            in_specs=in_specs,
            out_specs=out_specs,
        ),
        compiler_params=cparams,
        cost_estimate=cost,
        input_output_aliases={2: 0},     # adj aliases the output buffer
    )(keep_r, keep_c, adj)


def gsl_reference(adj, score, rate):
    """Pure-JAX reference mirroring the PyTorch loop semantics."""
    B, N, _ = adj.shape
    K = int(rate * N)
    if K <= 0:
        return jnp.zeros_like(adj)
    s = jnp.squeeze(score, axis=-1)
    _, idx = lax.top_k(s, K)
    keep = jnp.zeros((B, N), adj.dtype)
    keep = keep.at[jnp.arange(B)[:, None], idx].set(1.0)
    mask = jnp.maximum(keep[:, :, None], keep[:, None, :])
    return adj * mask


if __name__ == "__main__":
    key = jax.random.PRNGKey(0)
    rate = 0.5

    # --- small-graph path (batched planes per grid step) ---------------------
    B, N = 2, 16
    k_adj, k_score, key = jax.random.split(key, 3)
    adj = jax.random.uniform(k_adj, (B, N, N), dtype=jnp.float32)
    score = jax.random.normal(k_score, (B, N, 1), dtype=jnp.float32)

    out = jax.block_until_ready(gsl_forward(adj, score, rate))
    ref = gsl_reference(adj, score, rate)
    assert out.shape == (B, N, N)
    assert jnp.allclose(out, ref, atol=1e-6), "mismatch vs reference (small-N)"

    # --- row-tiled path (force small tile budget to exercise tiling) ---------
    B2, N2 = 1, 256
    k_adj2, k_score2, key = jax.random.split(key, 3)
    adj2 = jax.random.uniform(k_adj2, (B2, N2, N2), dtype=jnp.float32)
    score2 = jax.random.normal(k_score2, (B2, N2, 1), dtype=jnp.float32)

    out2 = jax.block_until_ready(
        gsl_forward(adj2, score2, rate, target_tile_bytes=64 * 1024)
    )
    ref2 = gsl_reference(adj2, score2, rate)
    assert jnp.allclose(out2, ref2, atol=1e-6), "mismatch vs reference (row-tiled)"

    print("KERNEL_OK")
</pallas_src>

<mosaic_0001>
module attributes {stable_mosaic.version = 11 : i64} {
  func.func @gsl_mask_kernel(%arg0: i32, %arg1: i32, %arg2: memref<2x16x1xf32, #tpu.memory_space<vmem>>, %arg3: memref<2x1x16xf32, #tpu.memory_space<vmem>>, %arg4: memref<2x16x16xf32, #tpu.memory_space<vmem>>, %arg5: memref<2x16x16xf32, #tpu.memory_space<vmem>>) attributes {dimension_semantics = [#tpu.dimension_semantics<parallel>, #tpu.dimension_semantics<parallel>], iteration_bounds = array<i64: 1, 1>, scalar_prefetch = 0 : i64, scratch_operands = 0 : i64, tpu.core_type = #tpu.core_type<tc>, window_params = [{transform_indices = @transform_0, window_bounds = array<i64: 2, 16, 1>}, {transform_indices = @transform_1, window_bounds = array<i64: 2, 1, 16>}, {transform_indices = @transform_2, window_bounds = array<i64: 2, 16, 16>}, {transform_indices = @transform_3, window_bounds = array<i64: 2, 16, 16>}]} {
    %c0 = arith.constant 0 : index
    %c0_0 = arith.constant 0 : index
    %c0_1 = arith.constant 0 : index
    %0 = vector.load %arg2[%c0, %c0_0, %c0_1] : memref<2x16x1xf32, #tpu.memory_space<vmem>>, vector<2x16x1xf32>
    %c0_2 = arith.constant 0 : index
    %c0_3 = arith.constant 0 : index
    %c0_4 = arith.constant 0 : index
    %1 = vector.load %arg3[%c0_2, %c0_3, %c0_4] : memref<2x1x16xf32, #tpu.memory_space<vmem>>, vector<2x1x16xf32>
    %2 = vector.broadcast %0 : vector<2x16x1xf32> to vector<2x16x16xf32>
    %3 = vector.broadcast %1 : vector<2x1x16xf32> to vector<2x16x16xf32>
    %4 = arith.maximumf %2, %3 : vector<2x16x16xf32>
    %c0_5 = arith.constant 0 : index
    %c0_6 = arith.constant 0 : index
    %c0_7 = arith.constant 0 : index
    %5 = vector.load %arg4[%c0_5, %c0_6, %c0_7] : memref<2x16x16xf32, #tpu.memory_space<vmem>>, vector<2x16x16xf32>
    %6 = arith.mulf %5, %4 : vector<2x16x16xf32>
    %c0_8 = arith.constant 0 : index
    %c0_9 = arith.constant 0 : index
    %c0_10 = arith.constant 0 : index
    %7 = vector.load %arg5[%c0_8, %c0_9, %c0_10] : memref<2x16x16xf32, #tpu.memory_space<vmem>>, vector<2x16x16xf32>
    tpu.vector_store %arg5[%c0_8, %c0_9, %c0_10], %6 {strides = array<i32>} : memref<2x16x16xf32, #tpu.memory_space<vmem>>, vector<2x16x16xf32>,
    return
  }
  func.func @transform_0(%arg0: i32, %arg1: i32) -> (i32, i32, i32) {
    %c0_i32 = arith.constant 0 : i32
    %c0_i32_0 = arith.constant 0 : i32
    %c0_i32_1 = arith.constant 0 : i32
    return %arg0, %c0_i32, %c0_i32_0 : i32, i32, i32
  }
  func.func @transform_1(%arg0: i32, %arg1: i32) -> (i32, i32, i32) {
    %c0_i32 = arith.constant 0 : i32
    %c0_i32_0 = arith.constant 0 : i32
    %c0_i32_1 = arith.constant 0 : i32
    return %arg0, %c0_i32, %c0_i32_0 : i32, i32, i32
  }
  func.func @transform_2(%arg0: i32, %arg1: i32) -> (i32, i32, i32) {
    %c0_i32 = arith.constant 0 : i32
    %c0_i32_0 = arith.constant 0 : i32
    %c0_i32_1 = arith.constant 0 : i32
    return %arg0, %c0_i32, %c0_i32_0 : i32, i32, i32
  }
  func.func @transform_3(%arg0: i32, %arg1: i32) -> (i32, i32, i32) {
    %c0_i32 = arith.constant 0 : i32
    %c0_i32_0 = arith.constant 0 : i32
    %c0_i32_1 = arith.constant 0 : i32
    return %arg0, %c0_i32, %c0_i32_0 : i32, i32, i32
  }
}

</mosaic_0001>

<bundles_post_ra>
// kernel: tpu_custom_call.1
= control target key start
LH: loop header
LB: loop body
LE: loop exit
PB: predicated region body
PF: predicated region fallthrough
CT: control target
= control target key end

     0   :  { %8 = vsyncpa [#allocation3], 0  ;;  %s213_s0 = inlined_call_operand.vmem [shape: f32[2,16,1], index: 0, kind: input, shape index: {}]   ;;  %s214_s1 = inlined_call_operand.vmem [shape: f32[2,1,16], index: 1, kind: input, shape index: {}]   ;;  %s215_s2 = inlined_call_operand.hbm [shape: f32[2,16,16], index: 2, kind: input, shape index: {}, may-alias: {2,3}]   ;;  %s216_s3 = inlined_call_operand.hbm [shape: f32[2,16,16], index: 3, kind: output, shape index: {}, may-alias: {2,3}]  }
   0x1   :  { %9 = vsyncpa [#allocation4], 0  ;;  %s154_s12 = smov [#allocation2]  }
   0x2   :  { %s19_s13 = sshll.u32 %s154_s12, 4  ;;  %s20_s13 = int_to_ptr.vmem [resolvable:$true] %s19_s13 }
   0x3   :  { %s118_s14 = scalar_lea.vmem %s20_s13, 512  ;;  %p123_p1 = scmp.lt.s32.totalorder %s20_s13, %s20_s13 }
   0x4   :  { %p119_p0 = scmp.ne.s32.totalorder %s20_s13, %s118_s14  ;;  %p124_p2 = scmp.lt.s32.totalorder %s118_s14, %s118_s14 }
   0x6   :  { %p125_p3 = por %p124_p2, %p123_p1 }
   0x8   :  { %p126_p4 = pnand %p125_p3, %p119_p0 }
   0xa   :  { %129 = shalt.err (!%p126_p4)
}
   0xb   :  { %s155_s15 = smov 128   ;;  %s156_s16 = smov 8  }
   0xc   :  { %25 = dma.hbm_to_vmem [thread:$0]  %s215_s2, 512, %s20_s13, [#allocation3], %s155_s15, %s155_s15, %s156_s16  }
   0xd   :  { %150 = dma.done.wait [#allocation3], 512  }
   0xe   :  { %151 = vsyncadd [#allocation3], 4294966784  ;;  %v157_v0 = vmov 0   ;;  %v31_v1 = vld [vmem:[%s213_s0 + $0x10] sm:$0xff]  ;;  %v29_v2 = vld [vmem:[%s213_s0] sm:$0xff]  ;;  %vm79_vm0 = vcmask 130048  }
   0xf   :  { %109 = vset.pattern.permute.xlu1 %v157_v0  ;;  %108 = vset.pattern.permute.xlu0 %v157_v0  ;;  %v32_v3 = vld [vmem:[%s213_s0 + $0x18] sm:$0xff]  ;;  %v30_v4 = vld [vmem:[%s213_s0 + $0x8] sm:$0xff]  ;;  %v102_v5 = vld [vmem:[%s214_s1 + $0x1] ss:$0 sm:$0xff]  ;;  %s158_s0 = smov [#allocation5]  }
  0x10   :  { %47 = vperm.xlu1 %109, %v31_v1   ;;  %37 = vperm.xlu0 %108, %v29_v2   ;;  %v101_v6 = vld [vmem:[%s214_s1] ss:$0 sm:$0xff]  ;;  %v73_v7 = vld [vmem:[#allocation2 + $0x10] sm:$0xff]  ;;  %v74_v15 = vld [vmem:[#allocation2 + $0x18] sm:$0xff]  ;;  %s89_s30 = sshll.u32 %s158_s0, 4  ;;  %s90_s30 = int_to_ptr.vmem [resolvable:$true] %s89_s30 }
  0x11   :  { %v71_v9 = vld [vmem:[#allocation2] sm:$0xff]  ;;  %v72_v17 = vld [vmem:[#allocation2 + $0x8] sm:$0xff]  ;;  %s130_s1 = scalar_lea.vmem %s90_s30, 512  ;;  %p135_p6 = scmp.lt.s32.totalorder %s90_s30, %s90_s30 }
  0x12   :  { %p131_p5 = scmp.ne.s32.totalorder %s90_s30, %s130_s1  ;;  %p136_p7 = scmp.lt.s32.totalorder %s130_s1, %s130_s1 }
  0x14   :  { %52 = vperm.xlu1 %109, %v32_v3   ;;  %42 = vperm.xlu0 %108, %v30_v4   ;;  %p137_p8 = por %p136_p7, %p135_p6 }
  0x16   :  { %p138_p9 = pnand %p137_p8, %p131_p5 }
  0x8b   :  { %v48_v8 = vpop.permute.xlu1 %47  ;;  %v38_v10 = vpop.permute.xlu0 %37 }
  0x8c   :  { %v69_v11 = vmax.f32 %v48_v8, %v102_v5  ;;  %v67_v12 = vmax.f32 %v38_v10, %v101_v6 }
  0x8e   :  { %v77_v13 = vmul.f32 %v73_v7, %v69_v11  ;;  %v75_v14 = vmul.f32 %v71_v9, %v67_v12 }
  0x8f   :  { %v53_v16 = vpop.permute.xlu1 %52  ;;  %v43_v18 = vpop.permute.xlu0 %42 }
  0x90   :  { %82 = vst.msk [vmem:[#allocation5 + $0x10] sm:$0xff] %vm79_vm0, %v77_v13  ;;  %80 = vst.msk [vmem:[#allocation5] sm:$0xff] %vm79_vm0, %v75_v14  ;;  %v70_v19 = vmax.f32 %v53_v16, %v102_v5  ;;  %v68_v20 = vmax.f32 %v43_v18, %v101_v6 }
  0x92   :  { %v78_v21 = vmul.f32 %v74_v15, %v70_v19  ;;  %v76_v22 = vmul.f32 %v72_v17, %v68_v20 }
  0x94   :  { %83 = vst.msk [vmem:[#allocation5 + $0x18] sm:$0xff] %vm79_vm0, %v78_v21  ;;  %81 = vst.msk [vmem:[#allocation5 + $0x8] sm:$0xff] %vm79_vm0, %v76_v22 }
  0x95   :  { %141 = shalt.err (!%p138_p9)
}
  0x96   :  { %95 = dma.vmem_to_hbm [thread:$0]  %s90_s30, 512, %s216_s3, [#allocation4], %s155_s15, %s155_s15, %s156_s16  }
  0x97   :  { %152 = dma.done.wait [#allocation4], 512  }
  0x98   :  { %153 = vsyncadd [#allocation4], 4294966784 }
  0x99   :  { %99 = vsyncpa [#allocation3], 1 }
  0x9a   :  { %100 = vsyncpa [#allocation4], 1 }

</bundles_post_ra>
